<compile_context>
chip_gen: v6e
topology: v6e:2x2x1
jax: 0.10.0
libtpu: 0.0.40
codegen_flags: <defaults>
</compile_context>

<pallas_src>
import functools

import jax
import jax.numpy as jnp
from jax.experimental import pallas as pl
from jax.experimental.pallas import tpu as pltpu

_LANE = 128
_MAX_BLOCK_ROWS = 8192                  # (8192,128) f32 = 4 MiB per block
_VMEM_LIMIT_BYTES = 32 * 1024 * 1024    # 2 x (4 MiB in + 4 MiB out) + headroom
_GOLDEN = 0x9E3779B9


@functools.lru_cache(maxsize=None)
def _bf16_eup_ok():
    """bf16 EUP exists on v6e/v7x; v5e and older upcast internally."""
    try:
        kind = jax.devices()[0].device_kind.lower()
    except Exception:
        return True
    return not any(tag in kind for tag in ("v2", "v3", "v4", "v5"))


def _hash_to_uniform(x):
    """splitmix32-style finalizer: uint32 -> float32 uniform in [0, 1)."""
    x = x ^ (x >> 16)
    x = x * jnp.uint32(0x7FEB352D)
    x = x ^ (x >> 15)
    x = x * jnp.uint32(0x846CA68B)
    x = x ^ (x >> 16)
    # Keep the top 24 bits -> exact float32 in [0, 1).
    return (x >> 8).astype(jnp.int32).astype(jnp.float32) * jnp.float32(
        1.0 / (1 << 24)
    )


def _sb_kernel_train(seed_ref, x_ref, o_ref, *, use_bf16):
    # x_ref/o_ref: (block_rows, 128) tile of the flattened logits.
    shape = x_ref.shape
    block_elems = shape[0] * shape[1]

    # Block-constant scalar offset, computed fully in uint32 (wraps instead of
    # overflowing int32 for huge tensors) and hoisted out of the per-element
    # hash expression.
    base = pl.program_id(0).astype(jnp.uint32) * jnp.uint32(block_elems)
    offset = base + seed_ref[0].astype(jnp.uint32) * jnp.uint32(_GOLDEN)

    row = jax.lax.broadcasted_iota(jnp.int32, shape, 0)
    lane = jax.lax.broadcasted_iota(jnp.int32, shape, 1)
    idx = (row * shape[1] + lane).astype(jnp.uint32) + offset
    u = _hash_to_uniform(idx)

    # sigmoid(x) > u  <=>  u * exp(-x) < 1 - u  : single EUP transcendental.
    x = x_ref[...]
    if use_bf16:
        # bf16 EUP path on v6e/v7x; precision is irrelevant for a stochastic
        # threshold compare.
        e = jnp.exp(-x.astype(jnp.bfloat16)).astype(jnp.float32)
    else:
        e = jnp.exp(-x)
    o_ref[...] = (u * e < (jnp.float32(1.0) - u)).astype(jnp.float32)


def _sb_kernel_eval(x_ref, o_ref):
    # sigmoid(x) > 0.5  <=>  x > 0  (exact, monotone): one VPU compare.
    o_ref[...] = (x_ref[...] > 0).astype(jnp.float32)


def _binarize_2d(x2d, seed_arr, *, training, use_bf16):
    """Run the Pallas kernel over a lane-dense (rows, 128) f32 slab."""
    rows = x2d.shape[0]
    if rows <= 8:
        block_rows = rows  # full dim (allowed even if not a multiple of 8)
    else:
        # Keep >=2 grid steps so ("parallel",) shards across v7x's two
        # TensorCores; cap blocks at 4 MiB to amortize per-step overhead.
        half = pl.cdiv(rows, 2)
        block_rows = min(_MAX_BLOCK_ROWS, pl.cdiv(half, 8) * 8)
    grid = (pl.cdiv(rows, block_rows),)
    out_shape = jax.ShapeDtypeStruct((rows, _LANE), jnp.float32)
    cparams = pltpu.CompilerParams(
        dimension_semantics=("parallel",),
        vmem_limit_bytes=_VMEM_LIMIT_BYTES,
    )

    if training:
        spec = pl.BlockSpec((block_rows, _LANE), lambda i, seed_ref: (i, 0))
        return pl.pallas_call(
            functools.partial(_sb_kernel_train, use_bf16=use_bf16),
            out_shape=out_shape,
            grid_spec=pltpu.PrefetchScalarGridSpec(
                num_scalar_prefetch=1,
                grid=grid,
                in_specs=[spec],
                out_specs=spec,
            ),
            compiler_params=cparams,
        )(seed_arr, x2d)

    spec = pl.BlockSpec((block_rows, _LANE), lambda i: (i, 0))
    return pl.pallas_call(
        _sb_kernel_eval,
        out_shape=out_shape,
        grid_spec=pltpu.PrefetchScalarGridSpec(
            num_scalar_prefetch=0,
            grid=grid,
            in_specs=[spec],
            out_specs=spec,
        ),
        compiler_params=cparams,
    )(x2d)


def _binarize_tail(x_flat, start, seed_u32, *, training):
    """Plain-jnp path for a <128-element tail (same hash stream as the kernel)."""
    if not training:
        return (x_flat > 0).astype(jnp.float32)
    idx = (
        jnp.arange(x_flat.shape[0], dtype=jnp.uint32)
        + jnp.uint32(start & 0xFFFFFFFF)
        + seed_u32 * jnp.uint32(_GOLDEN)
    )
    u = _hash_to_uniform(idx)
    return (jax.nn.sigmoid(x_flat) > u).astype(jnp.float32)


@functools.partial(jax.jit, static_argnames=("training",))
def stochastic_binarization(logits, *, training=False, seed=0):
    """Pallas implementation of StochasticBinarizationLayer.forward."""
    orig_shape = logits.shape
    flat = logits.reshape(-1)
    n = flat.shape[0]
    if n == 0:
        return jnp.zeros(orig_shape, jnp.float32)

    seed_arr = jnp.atleast_1d(jnp.asarray(seed, dtype=jnp.int32))
    seed_u32 = seed_arr[0].astype(jnp.uint32)
    use_bf16 = _bf16_eup_ok()

    n_body = (n // _LANE) * _LANE
    if n_body == n:
        # Common case: numel % 128 == 0 -> pure metadata reshape, no extra
        # HBM pass at all.
        out = _binarize_2d(
            flat.reshape(n // _LANE, _LANE),
            seed_arr,
            training=training,
            use_bf16=use_bf16,
        ).reshape(-1)
    elif n_body == 0:
        # Fewer than 128 elements: not worth a kernel launch.
        out = _binarize_tail(flat, 0, seed_u32, training=training)
    else:
        # Ragged size: 128-aligned body through the kernel, tiny tail in jnp;
        # avoids padding/slicing the whole tensor (extra HBM passes).
        body = _binarize_2d(
            flat[:n_body].reshape(n_body // _LANE, _LANE),
            seed_arr,
            training=training,
            use_bf16=use_bf16,
        ).reshape(-1)
        tail = _binarize_tail(flat[n_body:], n_body, seed_u32, training=training)
        out = jnp.concatenate([body, tail])

    return out.reshape(orig_shape)


if __name__ == "__main__":
    key = jax.random.PRNGKey(0)
    # (B, C, H, W) = (2, 4, 16, 16) latent/logit tensor.
    logits = jax.random.normal(key, (2, 4, 16, 16), dtype=jnp.float32)

    # Eval mode: deterministic threshold 0.5  <=>  (logits > 0).
    out_eval = stochastic_binarization(logits, training=False)
    jax.block_until_ready(out_eval)
    ref_eval = (logits > 0).astype(jnp.float32)
    assert out_eval.shape == logits.shape
    assert out_eval.dtype == jnp.float32
    assert bool(jnp.all(out_eval == ref_eval))

    # Training mode: stochastic threshold drawn from the in-kernel hash PRNG.
    out_train = stochastic_binarization(logits, training=True, seed=1234)
    jax.block_until_ready(out_train)
    assert out_train.shape == logits.shape
    # Output must be strictly binary.
    assert bool(jnp.all((out_train == 0.0) | (out_train == 1.0)))
    # Sanity: empirical firing rate tracks mean sigmoid probability.
    frac = float(jnp.mean(out_train))
    pbar = float(jnp.mean(jax.nn.sigmoid(logits)))
    assert abs(frac - pbar) < 0.08, (frac, pbar)

    # Ragged size (numel % 128 != 0): kernel body + jnp tail path.
    ragged = jax.random.normal(jax.random.PRNGKey(1), (5, 130), dtype=jnp.float32)
    out_r = stochastic_binarization(ragged, training=False)
    jax.block_until_ready(out_r)
    assert bool(jnp.all(out_r == (ragged > 0).astype(jnp.float32)))
    out_rt = stochastic_binarization(ragged, training=True, seed=7)
    jax.block_until_ready(out_rt)
    assert out_rt.shape == ragged.shape
    assert bool(jnp.all((out_rt == 0.0) | (out_rt == 1.0)))

    print("KERNEL_OK")
</pallas_src>

<mosaic_0001>
module attributes {stable_mosaic.version = 11 : i64} {
  func.func @_sb_kernel_eval(%arg0: i32, %arg1: memref<8x128xf32, #tpu.memory_space<vmem>>, %arg2: memref<8x128xf32, #tpu.memory_space<vmem>>) attributes {dimension_semantics = [#tpu.dimension_semantics<parallel>], iteration_bounds = array<i64: 2>, scalar_prefetch = 0 : i64, scratch_operands = 0 : i64, tpu.core_type = #tpu.core_type<tc>, window_params = [{transform_indices = @transform_0, window_bounds = array<i64: 8, 128>}, {transform_indices = @transform_1, window_bounds = array<i64: 8, 128>}]} {
    %c0 = arith.constant 0 : index
    %c0_0 = arith.constant 0 : index
    %0 = vector.load %arg1[%c0, %c0_0] : memref<8x128xf32, #tpu.memory_space<vmem>>, vector<8x128xf32>
    %cst = arith.constant 0.000000e+00 : f32
    %1 = vector.broadcast %cst : f32 to vector<8x128xf32>
    %2 = arith.cmpf ogt, %0, %1 : vector<8x128xf32>
    %3 = arith.extui %2 : vector<8x128xi1> to vector<8x128xi32>
    %4 = arith.sitofp %3 : vector<8x128xi32> to vector<8x128xf32>
    %c0_1 = arith.constant 0 : index
    %c0_2 = arith.constant 0 : index
    %5 = vector.load %arg2[%c0_1, %c0_2] : memref<8x128xf32, #tpu.memory_space<vmem>>, vector<8x128xf32>
    tpu.vector_store %arg2[%c0_1, %c0_2], %4 {strides = array<i32>} : memref<8x128xf32, #tpu.memory_space<vmem>>, vector<8x128xf32>,
    return
  }
  func.func @transform_0(%arg0: i32) -> (i32, i32) {
    %c0_i32 = arith.constant 0 : i32
    %c0_i32_0 = arith.constant 0 : i32
    return %arg0, %c0_i32 : i32, i32
  }
  func.func @transform_1(%arg0: i32) -> (i32, i32) {
    %c0_i32 = arith.constant 0 : i32
    %c0_i32_0 = arith.constant 0 : i32
    return %arg0, %c0_i32 : i32, i32
  }
}

</mosaic_0001>

<bundles_post_ra>
// kernel: stochastic_binarization.1
= control target key start
LH: loop header
LB: loop body
LE: loop exit
PB: predicated region body
PF: predicated region fallthrough
CT: control target
= control target key end

     0   :  { %s193_s6 = smov 0   ;;  %s214_s0 = inlined_call_operand.vmem [shape: f32[16,128], index: 0, kind: input, shape index: {}]   ;;  %s215_s1 = inlined_call_operand.vmem [shape: f32[16,128], index: 1, kind: output, shape index: {}]  }
   0x1 LB: > { %s170_s7 = sadd.s32 4294967295, %s195_s6   ;;  %p174_p0 = scmp.ge.s32.totalorder %s195_s6, 1  ;;  %s195_s6 = sphi %s193_s6, %s11_s6  }
   0x2   : > { %p86_p1 = scmp.lt.s32.totalorder %s195_s6, 3 }
   0x4   : > { %p87_p2 = pnand %p174_p0, %p86_p1 }
   0x5   : > { %p104_p3 = scmp.lt.s32.totalorder (!%p87_p2), %s170_s7, 1 }
   0x6   : > { %90 = sbr.rel (%p87_p2) target bundleno = 18 (0x12), region = 24 }
   0xb   : > { %s217_s7 = smov (!%p104_p3, %s170_s7), 1  ;;  %v197_v1 = vmov 0.0  }
   0xc   : > { %s175_s8 = sshll.u32 %s217_s7, 3 }
   0xd   : > { %s107_s11 = scalar_lea.vmem %s214_s0, %s175_s8  ;;  %s111_s14 = scalar_lea.vmem %s215_s1, %s175_s8 }
   0xe   : > { %v112_v0 = vld [vmem:[%s107_s11] sm:$0xff] }
   0xf   : > { %vm113_vm0 = vcmp.gt.f32.partialorder %v112_v0, 0.0 }
  0x10   : > { %v177_v2 = vsel %vm113_vm0, 1.0, %v197_v1 }
  0x11   : > { %116 = vst [vmem:[%s111_s14] sm:$0xff] %v177_v2 }
  0x12 PF: > { %s11_s6 = sadd.s32 1, %s195_s6  }
  0x13   : > { %p8_p4 = scmp.ge.s32.totalorder %s11_s6, 4  }
  0x15   :  { %10 = sbr.rel (!%p8_p4) target bundleno = 1 (0x1), region = 54 }

</bundles_post_ra>
